<compile_context>
chip_gen: v5e
topology: v5e:2x2
jax: 0.10.0
libtpu: 0.0.40
codegen_flags: <defaults>
</compile_context>

<pallas_src>
import functools

import jax
import jax.numpy as jnp
from jax import lax
from jax.experimental import pallas as pl
from jax.experimental.pallas import tpu as pltpu

LANES = 128   # per-loss vectors are padded to one full lane row
ROWS = 8      # one (8,128) f32 tile == one vreg

# Row layout of the packed state array.
ROW_L = 0        # current unweighted losses (written through for inspection)
ROW_RMEAN_L = 1  # running_mean_L
ROW_RMEAN_l = 2  # running_mean_l
ROW_RS_l = 3     # running_S_l
ROW_RSTD_l = 4   # running_std_l
ROW_ALPHAS = 5   # alphas
# rows 6, 7: padding (zeros)


def _cov_kernel(it_ref, losses_ref, state_ref, out_state_ref, loss_ref, *,
                num_losses, mean_decay, mean_decay_param):
    """One CoV-weighting training step on a single packed (8,128) tile."""
    it_i = it_ref[0]                       # int32 iteration counter (SMEM)
    it_f = it_i.astype(jnp.float32)

    lane = lax.broadcasted_iota(jnp.int32, (1, LANES), 1)
    mask = lane < num_losses               # static num_losses -> constant mask

    # Build the current-loss lane row from SMEM scalars (no wrapper-side padding).
    L = jnp.zeros((1, LANES), jnp.float32)
    for i in range(num_losses):            # static, small (num_losses) unrolled loop
        L = jnp.where(lane == i, losses_ref[i], L)

    rmL = state_ref[ROW_RMEAN_L:ROW_RMEAN_L + 1, :]
    rml = state_ref[ROW_RMEAN_l:ROW_RMEAN_l + 1, :]
    rSl = state_ref[ROW_RS_l:ROW_RS_l + 1, :]
    rstd = state_ref[ROW_RSTD_l:ROW_RSTD_l + 1, :]

    is_first = it_i == 0
    is_init = it_i <= 1

    # l = L / L0,   L0 = L (iter 0) else running_mean_L
    L0 = jnp.where(is_first, L, rmL)
    l = jnp.where(mask, L / jnp.where(mask, L0, 1.0), 0.0)

    # alphas + loss: two fused lane reductions + scalar epilogue.
    ls = jnp.where(mask, rstd / jnp.where(mask, rml, 1.0), 0.0)
    ls_sum = jnp.sum(ls)
    # init iters need sum(L); later iters need sum(ls * L) -> select then reduce once.
    sel_sum = jnp.sum(jnp.where(is_init, L, ls * L))

    inv_n = jnp.float32(1.0 / num_losses)
    inv_ls_sum = 1.0 / jnp.where(ls_sum == 0.0, 1.0, ls_sum)
    uniform = jnp.where(mask, inv_n, 0.0)
    alphas = jnp.where(is_init, uniform, ls * inv_ls_sum)
    loss = sel_sum * jnp.where(is_init, inv_n, inv_ls_sum)

    # mean_param (mean_decay & decay value are compile-time constants)
    if mean_decay:
        mp_later = jnp.float32(mean_decay_param)
    else:
        mp_later = 1.0 - 1.0 / (it_f + 1.0)
    mp = jnp.where(is_first, jnp.float32(0.0), mp_later)

    # Welford-style running statistics of l
    new_mean_l = mp * rml + (1.0 - mp) * l
    new_S_l = rSl + (l - rml) * (l - new_mean_l)
    new_std_l = jnp.where(mask, jnp.sqrt(new_S_l / (it_f + 1.0) + 1e-8), 0.0)

    # running mean of the raw losses
    new_mean_L = mp * rmL + (1.0 - mp) * L

    # Assemble the whole (8,128) tile in registers and store it once (unmasked vst).
    rowi = lax.broadcasted_iota(jnp.int32, (ROWS, LANES), 0)
    tile = (jnp.where(rowi == ROW_L, L, 0.0)
            + jnp.where(rowi == ROW_RMEAN_L, new_mean_L, 0.0)
            + jnp.where(rowi == ROW_RMEAN_l, new_mean_l, 0.0)
            + jnp.where(rowi == ROW_RS_l, new_S_l, 0.0)
            + jnp.where(rowi == ROW_RSTD_l, new_std_l, 0.0)
            + jnp.where(rowi == ROW_ALPHAS, alphas, 0.0))
    out_state_ref[...] = tile

    # Weighted loss goes out as a 4-byte SMEM scalar.
    loss_ref[0, 0] = loss


def _build_step(num_losses, mean_decay, mean_decay_param):
    """Build one jitted training step: (losses, state, iter) -> (loss, state, iter)."""
    kernel = functools.partial(
        _cov_kernel,
        num_losses=num_losses,
        mean_decay=mean_decay,
        mean_decay_param=mean_decay_param,
    )
    call = pl.pallas_call(
        kernel,
        out_shape=(
            jax.ShapeDtypeStruct((ROWS, LANES), jnp.float32),   # packed state
            jax.ShapeDtypeStruct((1, 1), jnp.float32),          # loss scalar
        ),
        in_specs=[
            pl.BlockSpec(memory_space=pltpu.MemorySpace.SMEM),   # iter (int32[1])
            pl.BlockSpec(memory_space=pltpu.MemorySpace.SMEM),   # losses f32[num_losses]
            pl.BlockSpec(memory_space=pltpu.MemorySpace.VMEM),   # packed state
        ],
        out_specs=(
            pl.BlockSpec(memory_space=pltpu.MemorySpace.VMEM),
            pl.BlockSpec(memory_space=pltpu.MemorySpace.SMEM),
        ),
        input_output_aliases={2: 0},   # packed state updated in place
    )

    @functools.partial(jax.jit, donate_argnums=(1,))   # donate the state buffer
    def step(losses, state, it_prev):
        it = it_prev + 1                                # device-resident counter, (1,) int32
        new_state, loss = call(it, losses, state)
        return loss[0, 0], new_state, it

    return step


class CoVWeightingLoss:
    """Functional-state JAX/Pallas port of the PyTorch CoVWeightingLoss module."""

    def __init__(self, num_losses=5, mean_decay_param=1.0, mean_sort='full'):
        self.num_losses = num_losses
        self.mean_decay = (mean_sort == 'decay')
        self.mean_decay_param = float(mean_decay_param)
        self.training = True
        # Packed device-resident state: one (8,128) f32 tile (see ROW_* layout).
        self.state = jnp.zeros((ROWS, LANES), jnp.float32)
        # current_iter starts at -1 (incremented inside the jitted step).
        self.it = jnp.array([-1], dtype=jnp.int32)
        self._step = _build_step(self.num_losses, self.mean_decay,
                                 self.mean_decay_param)

    @property
    def alphas(self):
        return self.state[ROW_ALPHAS, :self.num_losses]

    @property
    def running_mean_L(self):
        return self.state[ROW_RMEAN_L, :self.num_losses]

    def forward(self, unweighted_losses):
        if not self.training:
            # eval branch: plain sum of losses (glue, not the hot path)
            return jnp.sum(jnp.asarray(unweighted_losses, jnp.float32))
        losses = jnp.asarray(unweighted_losses, jnp.float32).reshape(-1)
        loss, self.state, self.it = self._step(losses, self.state, self.it)
        # TODO(synk): reference module calls print(self.alphas) here; omitted to
        # keep script output to exactly "KERNEL_OK".
        return loss


def _numpy_reference(loss_lists, num_losses=5, mean_decay_param=1.0,
                     mean_sort='full'):
    """Pure-python replica of the PyTorch forward for a correctness check."""
    import numpy as np
    mean_decay = (mean_sort == 'decay')
    rmL = np.zeros(num_losses); rml = np.zeros(num_losses)
    rSl = np.zeros(num_losses); rstd = np.zeros(num_losses)
    outs = []
    for it, losses in enumerate(loss_lists):
        L = np.asarray(losses, dtype=np.float64)
        L0 = L.copy() if it == 0 else rmL
        l = L / L0
        if it <= 1:
            alphas = np.ones(num_losses) / num_losses
        else:
            ls = rstd / rml
            alphas = ls / ls.sum()
        if it == 0:
            mp = 0.0
        elif mean_decay:
            mp = mean_decay_param
        else:
            mp = 1.0 - 1.0 / (it + 1)
        new_mean_l = mp * rml + (1 - mp) * l
        rSl = rSl + (l - rml) * (l - new_mean_l)
        rml = new_mean_l
        rstd = np.sqrt(rSl / (it + 1) + 1e-8)
        rmL = mp * rmL + (1 - mp) * L
        outs.append(float((alphas * L).sum()))
    return outs


if __name__ == "__main__":
    import numpy as np

    num_losses = 5
    key = jax.random.PRNGKey(0)
    # Three training iterations worth of positive scalar losses.
    all_losses = jax.random.uniform(key, (3, num_losses), jnp.float32,
                                    minval=0.1, maxval=2.0)

    module = CoVWeightingLoss(num_losses=num_losses)
    results = []
    for step_i in range(3):
        results.append(module.forward(all_losses[step_i]))   # no per-step host sync

    results = jax.block_until_ready(jnp.stack(results))       # single sync at the end
    ref = _numpy_reference(np.asarray(all_losses), num_losses=num_losses)
    assert np.allclose(np.asarray(results), np.asarray(ref), rtol=1e-4, atol=1e-5), \
        (np.asarray(results), ref)

    print("KERNEL_OK")
</pallas_src>

<mosaic_0001>
module attributes {stable_mosaic.version = 11 : i64} {
  func.func @_cov_kernel(%arg0: memref<1xi32, #tpu.memory_space<smem>>, %arg1: memref<5xf32, #tpu.memory_space<smem>>, %arg2: memref<8x128xf32, #tpu.memory_space<vmem>>, %arg3: memref<8x128xf32, #tpu.memory_space<vmem>>, %arg4: memref<1x1xf32, #tpu.memory_space<smem>>) attributes {dimension_semantics = [], scalar_prefetch = 0 : i64, scratch_operands = 0 : i64, tpu.core_type = #tpu.core_type<tc>} {
    %c0 = arith.constant 0 : index
    %0 = memref.load %arg0[%c0] : memref<1xi32, #tpu.memory_space<smem>>
    %1 = arith.sitofp %0 : i32 to f32
    %2 = tpu.iota {dimensions = array<i32: 1>} : vector<1x128xi32>
    %c5_i32 = arith.constant 5 : i32
    %3 = vector.broadcast %c5_i32 : i32 to vector<1x128xi32>
    %4 = arith.cmpi slt, %2, %3 : vector<1x128xi32>
    %cst = arith.constant 0.000000e+00 : f32
    %5 = vector.broadcast %cst : f32 to vector<1x128xf32>
    %c0_i32 = arith.constant 0 : i32
    %6 = vector.broadcast %c0_i32 : i32 to vector<1x128xi32>
    %7 = arith.cmpi eq, %2, %6 : vector<1x128xi32>
    %c0_0 = arith.constant 0 : index
    %8 = memref.load %arg1[%c0_0] : memref<5xf32, #tpu.memory_space<smem>>
    %9 = vector.broadcast %8 : f32 to vector<1x128xf32>
    %10 = arith.select %7, %9, %5 : vector<1x128xi1>, vector<1x128xf32>
    %c1_i32 = arith.constant 1 : i32
    %11 = vector.broadcast %c1_i32 : i32 to vector<1x128xi32>
    %12 = arith.cmpi eq, %2, %11 : vector<1x128xi32>
    %c1 = arith.constant 1 : index
    %13 = memref.load %arg1[%c1] : memref<5xf32, #tpu.memory_space<smem>>
    %14 = vector.broadcast %13 : f32 to vector<1x128xf32>
    %15 = arith.select %12, %14, %10 : vector<1x128xi1>, vector<1x128xf32>
    %c2_i32 = arith.constant 2 : i32
    %16 = vector.broadcast %c2_i32 : i32 to vector<1x128xi32>
    %17 = arith.cmpi eq, %2, %16 : vector<1x128xi32>
    %c2 = arith.constant 2 : index
    %18 = memref.load %arg1[%c2] : memref<5xf32, #tpu.memory_space<smem>>
    %19 = vector.broadcast %18 : f32 to vector<1x128xf32>
    %20 = arith.select %17, %19, %15 : vector<1x128xi1>, vector<1x128xf32>
    %c3_i32 = arith.constant 3 : i32
    %21 = vector.broadcast %c3_i32 : i32 to vector<1x128xi32>
    %22 = arith.cmpi eq, %2, %21 : vector<1x128xi32>
    %c3 = arith.constant 3 : index
    %23 = memref.load %arg1[%c3] : memref<5xf32, #tpu.memory_space<smem>>
    %24 = vector.broadcast %23 : f32 to vector<1x128xf32>
    %25 = arith.select %22, %24, %20 : vector<1x128xi1>, vector<1x128xf32>
    %c4_i32 = arith.constant 4 : i32
    %26 = vector.broadcast %c4_i32 : i32 to vector<1x128xi32>
    %27 = arith.cmpi eq, %2, %26 : vector<1x128xi32>
    %c4 = arith.constant 4 : index
    %28 = memref.load %arg1[%c4] : memref<5xf32, #tpu.memory_space<smem>>
    %29 = vector.broadcast %28 : f32 to vector<1x128xf32>
    %30 = arith.select %27, %29, %25 : vector<1x128xi1>, vector<1x128xf32>
    %c1_1 = arith.constant 1 : index
    %c0_2 = arith.constant 0 : index
    %31 = vector.load %arg2[%c1_1, %c0_2] : memref<8x128xf32, #tpu.memory_space<vmem>>, vector<1x128xf32>
    %c2_3 = arith.constant 2 : index
    %c0_4 = arith.constant 0 : index
    %32 = vector.load %arg2[%c2_3, %c0_4] : memref<8x128xf32, #tpu.memory_space<vmem>>, vector<1x128xf32>
    %c3_5 = arith.constant 3 : index
    %c0_6 = arith.constant 0 : index
    %33 = vector.load %arg2[%c3_5, %c0_6] : memref<8x128xf32, #tpu.memory_space<vmem>>, vector<1x128xf32>
    %c4_7 = arith.constant 4 : index
    %c0_8 = arith.constant 0 : index
    %34 = vector.load %arg2[%c4_7, %c0_8] : memref<8x128xf32, #tpu.memory_space<vmem>>, vector<1x128xf32>
    %c0_i32_9 = arith.constant 0 : i32
    %35 = arith.cmpi eq, %0, %c0_i32_9 : i32
    %c1_i32_10 = arith.constant 1 : i32
    %36 = arith.cmpi sle, %0, %c1_i32_10 : i32
    %37 = arith.select %35, %30, %31 : vector<1x128xf32>
    %cst_11 = arith.constant 1.000000e+00 : f32
    %38 = vector.broadcast %cst_11 : f32 to vector<1x128xf32>
    %39 = arith.select %4, %37, %38 : vector<1x128xi1>, vector<1x128xf32>
    %40 = arith.divf %30, %39 : vector<1x128xf32>
    %cst_12 = arith.constant 0.000000e+00 : f32
    %41 = vector.broadcast %cst_12 : f32 to vector<1x128xf32>
    %42 = arith.select %4, %40, %41 : vector<1x128xi1>, vector<1x128xf32>
    %cst_13 = arith.constant 1.000000e+00 : f32
    %43 = vector.broadcast %cst_13 : f32 to vector<1x128xf32>
    %44 = arith.select %4, %32, %43 : vector<1x128xi1>, vector<1x128xf32>
    %45 = arith.divf %34, %44 : vector<1x128xf32>
    %cst_14 = arith.constant 0.000000e+00 : f32
    %46 = vector.broadcast %cst_14 : f32 to vector<1x128xf32>
    %47 = arith.select %4, %45, %46 : vector<1x128xi1>, vector<1x128xf32>
    %48 = vector.shape_cast %47 : vector<1x128xf32> to vector<1x1x128xf32>
    %cst_15 = arith.constant dense<0.000000e+00> : vector<1xf32>
    %49 = vector.multi_reduction <add>, %48, %cst_15 [1, 2] : vector<1x1x128xf32> to vector<1xf32>
    %50 = vector.shape_cast %49 : vector<1xf32> to vector<1x1x1xf32>
    %51 = vector.extract %50[0, 0, 0] : f32 from vector<1x1x1xf32>
    %52 = arith.mulf %47, %30 : vector<1x128xf32>
    %53 = arith.select %36, %30, %52 : vector<1x128xf32>
    %54 = vector.shape_cast %53 : vector<1x128xf32> to vector<1x1x128xf32>
    %cst_16 = arith.constant dense<0.000000e+00> : vector<1xf32>
    %55 = vector.multi_reduction <add>, %54, %cst_16 [1, 2] : vector<1x1x128xf32> to vector<1xf32>
    %56 = vector.shape_cast %55 : vector<1xf32> to vector<1x1x1xf32>
    %57 = vector.extract %56[0, 0, 0] : f32 from vector<1x1x1xf32>
    %cst_17 = arith.constant 0.000000e+00 : f32
    %58 = arith.cmpf oeq, %51, %cst_17 : f32
    %cst_18 = arith.constant 1.000000e+00 : f32
    %59 = arith.select %58, %cst_18, %51 : f32
    %cst_19 = arith.constant 1.000000e+00 : f32
    %60 = arith.divf %cst_19, %59 : f32
    %cst_20 = arith.constant 2.000000e-01 : f32
    %cst_21 = arith.constant 0.000000e+00 : f32
    %61 = vector.broadcast %cst_20 : f32 to vector<1x128xf32>
    %62 = vector.broadcast %cst_21 : f32 to vector<1x128xf32>
    %63 = arith.select %4, %61, %62 : vector<1x128xi1>, vector<1x128xf32>
    %64 = vector.broadcast %60 : f32 to vector<1x128xf32>
    %65 = arith.mulf %47, %64 : vector<1x128xf32>
    %66 = arith.select %36, %63, %65 : vector<1x128xf32>
    %cst_22 = arith.constant 2.000000e-01 : f32
    %67 = arith.select %36, %cst_22, %60 : f32
    %68 = arith.mulf %57, %67 : f32
    %cst_23 = arith.constant 1.000000e+00 : f32
    %69 = arith.addf %1, %cst_23 : f32
    %cst_24 = arith.constant 1.000000e+00 : f32
    %70 = arith.divf %cst_24, %69 : f32
    %cst_25 = arith.constant 1.000000e+00 : f32
    %71 = arith.subf %cst_25, %70 : f32
    %cst_26 = arith.constant 0.000000e+00 : f32
    %72 = arith.select %35, %cst_26, %71 : f32
    %73 = vector.broadcast %72 : f32 to vector<1x128xf32>
    %74 = arith.mulf %73, %32 : vector<1x128xf32>
    %cst_27 = arith.constant 1.000000e+00 : f32
    %75 = arith.subf %cst_27, %72 : f32
    %76 = vector.broadcast %75 : f32 to vector<1x128xf32>
    %77 = arith.mulf %76, %42 : vector<1x128xf32>
    %78 = arith.addf %74, %77 : vector<1x128xf32>
    %79 = arith.subf %42, %32 : vector<1x128xf32>
    %80 = arith.subf %42, %78 : vector<1x128xf32>
    %81 = arith.mulf %79, %80 : vector<1x128xf32>
    %82 = arith.addf %33, %81 : vector<1x128xf32>
    %cst_28 = arith.constant 1.000000e+00 : f32
    %83 = arith.addf %1, %cst_28 : f32
    %84 = vector.broadcast %83 : f32 to vector<1x128xf32>
    %85 = arith.divf %82, %84 : vector<1x128xf32>
    %cst_29 = arith.constant 9.99999993E-9 : f32
    %86 = vector.broadcast %cst_29 : f32 to vector<1x128xf32>
    %87 = arith.addf %85, %86 : vector<1x128xf32>
    %88 = math.sqrt %87 : vector<1x128xf32>
    %cst_30 = arith.constant 0.000000e+00 : f32
    %89 = vector.broadcast %cst_30 : f32 to vector<1x128xf32>
    %90 = arith.select %4, %88, %89 : vector<1x128xi1>, vector<1x128xf32>
    %91 = vector.broadcast %72 : f32 to vector<1x128xf32>
    %92 = arith.mulf %91, %31 : vector<1x128xf32>
    %cst_31 = arith.constant 1.000000e+00 : f32
    %93 = arith.subf %cst_31, %72 : f32
    %94 = vector.broadcast %93 : f32 to vector<1x128xf32>
    %95 = arith.mulf %94, %30 : vector<1x128xf32>
    %96 = arith.addf %92, %95 : vector<1x128xf32>
    %97 = tpu.iota {dimensions = array<i32: 0>} : vector<8x128xi32>
    %c0_i32_32 = arith.constant 0 : i32
    %98 = vector.broadcast %c0_i32_32 : i32 to vector<8x128xi32>
    %99 = arith.cmpi eq, %97, %98 : vector<8x128xi32>
    %cst_33 = arith.constant 0.000000e+00 : f32
    %100 = vector.shape_cast %30 : vector<1x128xf32> to vector<1x128xf32>
    %101 = vector.broadcast %100 : vector<1x128xf32> to vector<8x128xf32>
    %102 = vector.broadcast %cst_33 : f32 to vector<8x128xf32>
    %103 = arith.select %99, %101, %102 : vector<8x128xi1>, vector<8x128xf32>
    %c1_i32_34 = arith.constant 1 : i32
    %104 = vector.broadcast %c1_i32_34 : i32 to vector<8x128xi32>
    %105 = arith.cmpi eq, %97, %104 : vector<8x128xi32>
    %cst_35 = arith.constant 0.000000e+00 : f32
    %106 = vector.shape_cast %96 : vector<1x128xf32> to vector<1x128xf32>
    %107 = vector.broadcast %106 : vector<1x128xf32> to vector<8x128xf32>
    %108 = vector.broadcast %cst_35 : f32 to vector<8x128xf32>
    %109 = arith.select %105, %107, %108 : vector<8x128xi1>, vector<8x128xf32>
    %110 = arith.addf %103, %109 : vector<8x128xf32>
    %c2_i32_36 = arith.constant 2 : i32
    %111 = vector.broadcast %c2_i32_36 : i32 to vector<8x128xi32>
    %112 = arith.cmpi eq, %97, %111 : vector<8x128xi32>
    %cst_37 = arith.constant 0.000000e+00 : f32
    %113 = vector.shape_cast %78 : vector<1x128xf32> to vector<1x128xf32>
    %114 = vector.broadcast %113 : vector<1x128xf32> to vector<8x128xf32>
    %115 = vector.broadcast %cst_37 : f32 to vector<8x128xf32>
    %116 = arith.select %112, %114, %115 : vector<8x128xi1>, vector<8x128xf32>
    %117 = arith.addf %110, %116 : vector<8x128xf32>
    %c3_i32_38 = arith.constant 3 : i32
    %118 = vector.broadcast %c3_i32_38 : i32 to vector<8x128xi32>
    %119 = arith.cmpi eq, %97, %118 : vector<8x128xi32>
    %cst_39 = arith.constant 0.000000e+00 : f32
    %120 = vector.shape_cast %82 : vector<1x128xf32> to vector<1x128xf32>
    %121 = vector.broadcast %120 : vector<1x128xf32> to vector<8x128xf32>
    %122 = vector.broadcast %cst_39 : f32 to vector<8x128xf32>
    %123 = arith.select %119, %121, %122 : vector<8x128xi1>, vector<8x128xf32>
    %124 = arith.addf %117, %123 : vector<8x128xf32>
    %c4_i32_40 = arith.constant 4 : i32
    %125 = vector.broadcast %c4_i32_40 : i32 to vector<8x128xi32>
    %126 = arith.cmpi eq, %97, %125 : vector<8x128xi32>
    %cst_41 = arith.constant 0.000000e+00 : f32
    %127 = vector.shape_cast %90 : vector<1x128xf32> to vector<1x128xf32>
    %128 = vector.broadcast %127 : vector<1x128xf32> to vector<8x128xf32>
    %129 = vector.broadcast %cst_41 : f32 to vector<8x128xf32>
    %130 = arith.select %126, %128, %129 : vector<8x128xi1>, vector<8x128xf32>
    %131 = arith.addf %124, %130 : vector<8x128xf32>
    %c5_i32_42 = arith.constant 5 : i32
    %132 = vector.broadcast %c5_i32_42 : i32 to vector<8x128xi32>
    %133 = arith.cmpi eq, %97, %132 : vector<8x128xi32>
    %cst_43 = arith.constant 0.000000e+00 : f32
    %134 = vector.shape_cast %66 : vector<1x128xf32> to vector<1x128xf32>
    %135 = vector.broadcast %134 : vector<1x128xf32> to vector<8x128xf32>
    %136 = vector.broadcast %cst_43 : f32 to vector<8x128xf32>
    %137 = arith.select %133, %135, %136 : vector<8x128xi1>, vector<8x128xf32>
    %138 = arith.addf %131, %137 : vector<8x128xf32>
    %c0_44 = arith.constant 0 : index
    %c0_45 = arith.constant 0 : index
    %139 = vector.load %arg3[%c0_44, %c0_45] : memref<8x128xf32, #tpu.memory_space<vmem>>, vector<8x128xf32>
    tpu.vector_store %arg3[%c0_44, %c0_45], %138 {strides = array<i32>} : memref<8x128xf32, #tpu.memory_space<vmem>>, vector<8x128xf32>,
    %c0_46 = arith.constant 0 : index
    %c0_47 = arith.constant 0 : index
    %140 = memref.load %arg4[%c0_46, %c0_47] : memref<1x1xf32, #tpu.memory_space<smem>>
    memref.store %68, %arg4[%c0_46, %c0_47] : memref<1x1xf32, #tpu.memory_space<smem>>
    return
  }
}

</mosaic_0001>

<bundles_post_ra>
// kernel: step.1
= control target key start
LH: loop header
LB: loop body
LE: loop exit
PB: predicated region body
PF: predicated region fallthrough
CT: control target
= control target key end

     0   :  { %11 = vsyncpa [#allocation7], 0  ;;  %s513_s0 = inlined_call_operand.<no memory space> [shape: s32[1], index: 0, kind: input, shape index: {}]   ;;  %s514_s1 = inlined_call_operand.vmem [shape: f32[5], index: 1, kind: input, shape index: {}]   ;;  %s515_s2 = inlined_call_operand.hbm [shape: f32[8,128], index: 2, kind: input, shape index: {}, may-alias: {2,3}]   ;;  %s516_s3 = inlined_call_operand.hbm [shape: f32[8,128], index: 3, kind: output, shape index: {0}, may-alias: {2,3}]   ;;  %s517_s4 = inlined_call_operand.hbm [shape: f32[1,1], index: 4, kind: output, shape index: {1}]  }
   0x1   :  { %12 = vsyncpa [#allocation4], 0 }
   0x2   :  { %13 = vsyncpa [#allocation5], 0 }
   0x3   :  { %14 = vsyncpa [#allocation6], 0  ;;  %s22_s17 = sshll.u32 %s514_s1, 4  ;;  %s31_s20 = sshll.u32 %s515_s2, 4  ;;  %s23_s17 = int_to_ptr.vmem [resolvable:$true] %s22_s17  ;;  %s32_s20 = int_to_ptr.hbm [resolvable:$true] %s31_s20 }
   0x4   :  { %s394_s21 = smov [#allocation3]   ;;  %s395_s22 = smov [#allocation8]  }
   0x5   :  { %25 = dma.vmem_to_smem %s23_s17, 16, %s394_s21, [#allocation7]  }
   0x6   :  { %s33_s23 = sshll.u32 %s395_s22, 4  ;;  %s34_s23 = int_to_ptr.vmem [resolvable:$true] %s33_s23 }
   0x7   :  { %36 = dma.hbm_to_vmem [thread:$0]  %s32_s20, 128, %s34_s23, [#allocation4]  }
   0x8   :  { %386 = dma.done.wait [#allocation7], 16  }
   0x9   :  { %387 = vsyncadd [#allocation7], 4294967280 }
   0xa   :  { %388 = dma.done.wait [#allocation4], 128  }
   0xb   :  { %389 = vsyncadd [#allocation4], 4294967168 }
   0xc   :  { %45 = sfence }
   0xd   :  { %v48_v0 = vlaneseq  ;;  %s52_s24 = sld [smem:[#allocation3]]  ;;  %v433_v2 = vld [vmem:[#allocation8 + $0x2] sm:$0x1]  ;;  %p76_p0 = scmp.le.s32.totalorder %s513_s0, 1  ;;  %v74_v21 = vld [vmem:[#allocation8 + $0x4] sm:$0x1] }
   0xe   :  { %s287_s1 = sld [smem:[#allocation3 + $0x1]]  ;;  %vm115_vm10 = vcmask 1040384   ;;  %s47_s8 = scvt.s32.f32 %s513_s0 }
   0xf   :  { %v431_v1 = vand.u32 127, %v48_v0  ;;  %s288_s2 = sld [smem:[#allocation3 + $0x2]]  ;;  %p75_p2 = scmp.eq.s32.totalorder %s513_s0, 0 }
  0x10   :  { %s289_s25 = sld [smem:[#allocation3 + $0x3]]  ;;  %s270_s20 = sshll.u32 %s517_s4, 4  ;;  %s271_s20 = int_to_ptr.hbm [resolvable:$true] %s270_s20 }
  0x11   :  { %vm50_vm0 = vcmp.lt.s32.totalorder %v431_v1, 5  ;;  %vm51_vm1 = vcmp.eq.s32.totalorder %v431_v1, 0  ;;  %vm55_vm2 = vcmp.eq.s32.totalorder %v431_v1, 1  ;;  %s290_s26 = sld [smem:[#allocation3 + $0x4]]  ;;  %vm59_vm3 = vcmp.eq.s32.totalorder %v431_v1, 2  ;;  %s396_s27 = smov [#allocation10]  }
  0x12   :  { %v98_v3 = vsel %vm50_vm0, %v433_v2, 1.0  ;;  %vm63_vm6 = vcmp.eq.s32.totalorder %v431_v1, 3  ;;  %s127_s5 = scalar_select %p76_p0, 1, 0  ;;  %vm67_vm9 = vcmp.eq.s32.totalorder %v431_v1, 4 }
  0x13   :  { %304 = vrcp.f32 %v98_v3  ;;  %v53_v4 = vstv %s52_s24  ;;  %v110_v11 = vand.u32 2147483648, %v98_v3  ;;  %vm104_vm4 = vweird.f32 %v98_v3  ;;  %s165_s9 = sadd.f32 1.0, %s47_s8  ;;  %s398_s0 = smov [#allocation9]  }
  0x14   :  { %v54_v5 = vsel %vm51_vm1, %v53_v4, 0.0  ;;  %v57_v6 = vstv %s287_s1  ;;  %v108_v13 = vand.u32 2147483647, %v98_v3  ;;  %v128_v26 = vstv %s127_s5  ;;  %s77_s15 = scalar_select %p75_p2, 1, 0 }
  0x15   :  { %v58_v9 = vsel %vm55_vm2, %v57_v6, %v54_v5  ;;  %v61_v10 = vstv %s288_s2  ;;  %v111_v17 = vor.u32 1.1754944e-38, %v110_v11  ;;  %vm460_vm11 = vcmp.eq.s32.totalorder %v128_v26, 1  ;;  %s259_s28 = sshll.u32 %s398_s0, 4  ;;  %s261_s5 = sshll.u32 %s516_s3, 4  ;;  %s260_s28 = int_to_ptr.vmem [resolvable:$true] %s259_s28  ;;  %s262_s5 = int_to_ptr.hbm [resolvable:$true] %s261_s5 }
  0x16   :  { %v62_v14 = vsel %vm59_vm3, %v61_v10, %v58_v9  ;;  %v65_v15 = vstv %s289_s25  ;;  %vm109_vm8 = vcmp.eq.f32.partialorder %v108_v13, 8.507059e+37  ;;  %v166_v47 = vstv %s165_s9  ;;  %v71_v9 = vld [vmem:[#allocation8 + $0x1] sm:$0x1] }
  0x17   :  { %v66_v19 = vsel %vm63_vm6, %v65_v15, %v62_v14  ;;  %v69_v20 = vstv %s290_s26  ;;  %306 = vrcp.f32 %v166_v47  ;;  %vm172_vm12 = vweird.f32 %v166_v47 }
  0x18   :  { %v451_v24 = vsel %vm67_vm9, %v69_v20, %v66_v19  ;;  %v178_v55 = vand.u32 2147483648, %v166_v47  ;;  %v176_v57 = vand.u32 2147483647, %v166_v47 }
  0x19   :  { %v305_v7 = vpop.eup %304 }
  0x1a   :  { %v100_v8 = vmul.f32 %v305_v7, %v98_v3  ;;  %vm105_vm5 = vweird.f32 %v305_v7  ;;  %v179_v62 = vor.u32 1.1754944e-38, %v178_v55  ;;  %vm177_vm1 = vcmp.eq.f32.partialorder %v176_v57, 8.507059e+37 }
  0x1b   :  { %vm106_vm7 = vmor %vm104_vm4, %vm105_vm5 }
  0x1c   :  { %v101_v12 = vsub.f32 1.0, %v100_v8  ;;  %v78_v8 = vstv %s77_s15 }
  0x1d   :  { %v307_v48 = vpop.eup %306  ;;  %vm79_vm5 = vcmp.eq.s32.totalorder %v78_v8, 1 }
  0x1e   :  { %v102_v16 = vmul.f32 %v305_v7, %v101_v12  ;;  %v168_v49 = vmul.f32 %v307_v48, %v166_v47  ;;  %vm173_vm13 = vweird.f32 %v307_v48  ;;  %v80_v10 = vsel %vm79_vm5, %v451_v24, %v71_v9 }
  0x1f   :  { %vm174_vm14 = vmor %vm172_vm12, %vm173_vm13  ;;  %v81_v11 = vsel %vm50_vm0, %v80_v10, 1.0 }
  0x20   :  { %v103_v18 = vadd.f32 %v305_v7, %v102_v16  ;;  %v169_v51 = vsub.f32 1.0, %v168_v49  ;;  %vm87_vm6 = vweird.f32 %v81_v11  ;;  %v93_v16 = vand.u32 2147483648, %v81_v11 }
  0x22   :  { %v107_v22 = vsel %vm106_vm7, %v305_v7, %v103_v18  ;;  %v170_v52 = vmul.f32 %v307_v48, %v169_v51  ;;  %v91_v18 = vand.u32 2147483647, %v81_v11  ;;  %v94_v19 = vor.u32 1.1754944e-38, %v93_v16 }
  0x23   :  { %v112_v23 = vsel %vm109_vm8, %v111_v17, %v107_v22 }
  0x24   :  { %v113_v25 = vmul.f32 %v112_v23, %v74_v21  ;;  %v171_v56 = vadd.f32 %v307_v48, %v170_v52  ;;  %vm92_vm9 = vcmp.eq.f32.partialorder %v91_v18, 8.507059e+37 }
  0x26   :  { %v455_v27 = vsel %vm50_vm0, %v113_v25, 0.0  ;;  %v175_v63 = vsel %vm174_vm14, %v307_v48, %v171_v56 }
  0x27   :  { %v116_v28 = vsel %vm115_vm10, %v455_v27, 0.0  ;;  %v126_v29 = vmul.f32 %v455_v27, %v451_v24  ;;  %v180_v6 = vsel %vm177_vm1, %v179_v62, %v175_v63 }
  0x28   :  { %117 = vadd.xlane.f32.xlu0 %v116_v28 }
  0x29   :  { %v130_v31 = vsel %vm460_vm11, %v451_v24, %v126_v29 }
  0x2a   :  { %v131_v32 = vsel %vm115_vm10, %v130_v31, 0.0 }
  0x30   :  { %132 = vadd.xlane.f32.xlu0 %v131_v32 }
  0x9b   :  { %v118_v33 = vpop.xlane.xlu0 %117 }
  0x9c   :  { %v119_v34 = vrot.slane %v118_v33, 4 }
  0x9e   :  { %v120_v35 = vadd.f32 %v119_v34, %v118_v33  ;;  %v73_v34 = vld [vmem:[#allocation8 + $0x3] sm:$0x1] }
  0xa0   :  { %v121_v36 = vrot.slane %v120_v35, 2 }
  0xa2   :  { %v122_v37 = vadd.f32 %v121_v36, %v120_v35 }
  0xa3   :  { %v133_v40 = vpop.xlane.xlu0 %132 }
  0xa4   :  { %v123_v38 = vrot.slane %v122_v37, 1  ;;  %v134_v41 = vrot.slane %v133_v40, 4 }
  0xa6   :  { %v124_v39 = vadd.f32 %v123_v38, %v122_v37  ;;  %v135_v42 = vadd.f32 %v134_v41, %v133_v40 }
  0xa8   :  { %291 = vpush %v124_v39  ;;  %v136_v43 = vrot.slane %v135_v42, 2 }
  0xaa   :  { %v137_v44 = vadd.f32 %v136_v43, %v135_v42 }
  0xac   :  { %v138_v45 = vrot.slane %v137_v44, 1 }
  0xae   :  { %v139_v46 = vadd.f32 %v138_v45, %v137_v44  ;;  %v228_v44 = vshrl.u32 %v48_v0, 7 }
  0xb0   :  { %293 = vpush %v139_v46  ;;  %vm231_vm10 = vcmp.eq.s32.totalorder %v228_v44, 1  ;;  %vm229_vm12 = vcmp.eq.s32.totalorder %v228_v44, 0  ;;  %vm235_vm13 = vcmp.eq.s32.totalorder %v228_v44, 2  ;;  %vm239_vm14 = vcmp.eq.s32.totalorder %v228_v44, 3 }
  0xd9   :  { %s292_s10 = spop %291 }
  0xda   :  { %p141_p1 = scmp.eq.f32.partialorder %s292_s10, 0.0 }
  0xdc   :  { %s521_s10 = smov (%p141_p1, %s292_s10), 1.0 }
  0xdd   :  { %v143_v50 = vstv %s521_s10 }
  0xde   :  { %308 = vrcp.f32 %v143_v50  ;;  %v155_v59 = vand.u32 2147483648, %v143_v50  ;;  %v153_v61 = vand.u32 2147483647, %v143_v50  ;;  %vm149_vm2 = vweird.f32 %v143_v50 }
  0xdf   :  { %310 = vrcp.f32 %v81_v11 }
  0xe0   :  { %v156_v4 = vor.u32 1.1754944e-38, %v155_v59  ;;  %vm154_vm4 = vcmp.eq.f32.partialorder %v153_v61, 8.507059e+37 }
  0xe1   :  { %s294_s16 = spop %293 }
  0xe4   :  { %v309_v53 = vpop.eup %308 }
  0xe5   :  { %v145_v54 = vmul.f32 %v309_v53, %v143_v50  ;;  %vm150_vm15 = vweird.f32 %v309_v53  ;;  %v311_v12 = vpop.eup %310  ;;  %v230_v50 = vsel %vm229_vm12, %v451_v24, 0.0 }
  0xe6   :  { %vm151_vm3 = vmor %vm149_vm2, %vm150_vm15  ;;  %v83_v13 = vmul.f32 %v311_v12, %v81_v11  ;;  %vm88_vm7 = vweird.f32 %v311_v12  ;;  %vm243_vm2 = vcmp.eq.s32.totalorder %v228_v44, 4 }
  0xe7   :  { %v146_v58 = vsub.f32 1.0, %v145_v54  ;;  %vm89_vm8 = vmor %vm87_vm6, %vm88_vm7  ;;  %v397_v54 = vmov 0.0  }
  0xe8   :  { %v84_v14 = vsub.f32 1.0, %v83_v13  ;;  %v159_v55 = vsel %vm50_vm0, 0.2, %v397_v54 }
  0xe9   :  { %v147_v60 = vmul.f32 %v309_v53, %v146_v58 }
  0xea   :  { %v85_v15 = vmul.f32 %v311_v12, %v84_v14 }
  0xeb   :  { %v148_v3 = vadd.f32 %v309_v53, %v147_v60 }
  0xec   :  { %v86_v17 = vadd.f32 %v311_v12, %v85_v15 }
  0xed   :  { %v152_v5 = vsel %vm151_vm3, %v309_v53, %v148_v3  ;;  %vm247_vm3 = vcmp.eq.s32.totalorder %v228_v44, 5 }
  0xee   :  { %v157_v7 = vsel %vm154_vm4, %v156_v4, %v152_v5  ;;  %v90_v20 = vsel %vm89_vm8, %v311_v12, %v86_v17 }
  0xef   :  { %295 = vpush %v157_v7  ;;  %v95_v21 = vsel %vm92_vm9, %v94_v19, %v90_v20 }
  0xf0   :  { %297 = vpush %v180_v6  ;;  %v96_v22 = vmul.f32 %v95_v21, %v451_v24 }
  0xf2   :  { %v97_v23 = vsel %vm50_vm0, %v96_v22, 0.0 }
  0xf3   :  { %v190_v32 = vsub.f32 %v97_v23, %v433_v2 }
 0x120   :  { %s480_s17 = spop %295 }
 0x121   :  { %s163_s23 = scalar_select %p76_p0, 0.2, %s480_s17  ;;  %v160_v47 = vstv %s480_s17 }
 0x122   :  { %s298_s24 = spop %297  ;;  %v161_v51 = vmul.f32 %v160_v47, %v455_v27 }
 0x123   :  { %s182_s1 = ssub.f32 1.0, %s298_s24  ;;  %s164_s2 = smul.f32 %s294_s16, %s163_s23 }
 0x124   :  { %v162_v59 = vsel %vm460_vm11, %v159_v55, %v161_v51 }
 0x125   :  { %s523_s1 = smov (%p75_p2, %s182_s1), 0.0  ;;  %253 = sst [smem:[#allocation10]] %s164_s2  ;;  %v248_v4 = vperm.slane %v162_v59, 0 }
 0x126   :  { %v184_v25 = vstv %s523_s1  ;;  %s186_s4 = ssub.f32 1.0, %s523_s1 }
 0x127   :  { %273 = dma.smem_to_hbm %s396_s27, 16, %s271_s20, [#allocation6]   ;;  %v185_v28 = vmul.f32 %v184_v25, %v433_v2  ;;  %v224_v40 = vmul.f32 %v184_v25, %v71_v9  ;;  %v249_v7 = vsel %vm247_vm3, %v248_v4, 0.0 }
 0x128   :  { %v187_v26 = vstv %s186_s4 }
 0x129   :  { %v188_v29 = vmul.f32 %v187_v26, %v97_v23  ;;  %v225_v39 = vmul.f32 %v187_v26, %v451_v24 }
 0x12b   :  { %v189_v31 = vadd.f32 %v188_v29, %v185_v28  ;;  %v226_v42 = vadd.f32 %v225_v39, %v224_v40 }
 0x12d   :  { %v191_v33 = vsub.f32 %v97_v23, %v189_v31  ;;  %v232_v46 = vperm.slane %v226_v42, 0  ;;  %v236_v53 = vperm.slane %v189_v31, 0 }
 0x12f   :  { %v192_v35 = vmul.f32 %v191_v33, %v190_v32  ;;  %v233_v49 = vsel %vm231_vm10, %v232_v46, 0.0  ;;  %v237_v27 = vsel %vm235_vm13, %v236_v53, 0.0 }
 0x130   :  { %v234_v57 = vadd.f32 %v233_v49, %v230_v50 }
 0x131   :  { %v193_v36 = vadd.f32 %v192_v35, %v73_v34 }
 0x132   :  { %v238_v63 = vadd.f32 %v237_v27, %v234_v57 }
 0x133   :  { %v209_v37 = vmul.f32 %v193_v36, %v180_v6  ;;  %v240_v56 = vperm.slane %v193_v36, 0 }
 0x135   :  { %v210_v38 = vadd.f32 1e-08, %v209_v37  ;;  %v241_v61 = vsel %vm239_vm14, %v240_v56, 0.0 }
 0x136   :  { %v242_v5 = vadd.f32 %v241_v61, %v238_v63 }
 0x137   :  { %312 = vrsqrt.f32 %v210_v38  ;;  %vm218_vm15 = vcmp.eq.f32.partialorder %v210_v38, inf  ;;  %v221_v58 = vand.u32 2147483648, %v210_v38  ;;  %vm220_vm1 = vcmp.eq.f32.partialorder %v210_v38, 0.0 }
 0x13d   :  { %v313_v41 = vpop.eup %312 }
 0x13e   :  { %v212_v43 = vmul.f32 %v313_v41, %v210_v38 }
 0x140   :  { %v213_v45 = vmul.f32 %v313_v41, %v212_v43 }
 0x142   :  { %v214_v2 = vmul.f32 0.5, %v213_v45 }
 0x144   :  { %v215_v48 = vsub.f32 1.5, %v214_v2 }
 0x146   :  { %v216_v52 = vmul.f32 %v313_v41, %v215_v48 }
 0x148   :  { %v217_v0 = vmul.f32 %v216_v52, %v210_v38 }
 0x14a   :  { %v219_v60 = vsel %vm218_vm15, %v210_v38, %v217_v0 }
 0x14b   :  { %v222_v24 = vsel %vm220_vm1, %v221_v58, %v219_v60 }
 0x14c   :  { %v223_v62 = vsel %vm50_vm0, %v222_v24, 0.0 }
 0x14d   :  { %v244_v3 = vperm.slane %v223_v62, 0 }
 0x14f   :  { %v245_v6 = vsel %vm243_vm2, %v244_v3, 0.0 }
 0x150   :  { %v246_v30 = vadd.f32 %v245_v6, %v242_v5 }
 0x152   :  { %v250_v8 = vadd.f32 %v249_v7, %v246_v30 }
 0x154   :  { %251 = vst [vmem:[#allocation9] sm:$0xff] %v250_v8 }
 0x155   :  { %264 = dma.vmem_to_hbm [thread:$0]  %s260_s28, 128, %s262_s5, [#allocation5]  }
 0x156   :  { %390 = dma.done.wait [#allocation5], 128  }
 0x157   :  { %391 = vsyncadd [#allocation5], 4294967168 }
 0x158   :  { %392 = dma.done.wait [#allocation6], 16  }
 0x159   :  { %393 = vsyncadd [#allocation6], 4294967280 }
 0x15a   :  { %282 = sfence }
 0x15b   :  { %283 = vsyncpa [#allocation4], 1 }
 0x15c   :  { %284 = vsyncpa [#allocation5], 1 }
 0x15d   :  { %285 = vsyncpa [#allocation6], 1 }
 0x15e   :  { %286 = vsyncpa [#allocation7], 1 }

</bundles_post_ra>
